<compile_context>
chip_gen: v6e
topology: v6e:2x2x1
jax: 0.10.0
libtpu: 0.0.40
codegen_flags: <defaults>
</compile_context>

<pallas_src>
import jax
import jax.numpy as jnp
from jax.experimental import pallas as pl
from jax.experimental.pallas import tpu as pltpu

IN_FEATURES = 13
HIDDEN1 = 100
HIDDEN2 = 50
OUT_FEATURES = 2
MAX_TB = 2048  # keeps double-buffered tiles + intermediates ~8 MiB of VMEM


def mlp_kernel(x_ref, w1_ref, b1_ref, w2_ref, b2_ref, w3_ref, b3_ref, o_ref):
    # One batch tile; all three layers fused. Weights/biases are VMEM-resident
    # (constant index_map); only the x tile streams in and the (TB, 2) result
    # tile streams out per grid step.
    x = x_ref[...]

    h1 = jnp.dot(x, w1_ref[...], preferred_element_type=jnp.float32) + b1_ref[...]
    h1 = jnp.maximum(h1, 0.0)

    h2 = jnp.dot(h1, w2_ref[...], preferred_element_type=jnp.float32) + b2_ref[...]
    h2 = jnp.maximum(h2, 0.0)

    h3 = jnp.dot(h2, w3_ref[...], preferred_element_type=jnp.float32) + b3_ref[...]
    o_ref[...] = h3.astype(o_ref.dtype)


def _round_up(n, m):
    return ((n + m - 1) // m) * m


def _pick_batch_tile(B):
    # Tiny batches: one tile covering the whole batch (splitting only adds
    # per-step overhead). Larger batches: at least 2 grid steps so both v7x
    # TensorCores get work, capped at MAX_TB rows to stay within the v5e
    # scoped-VMEM default. Always a multiple of 8 (sublane granularity).
    if B <= 256:
        return max(8, _round_up(B, 8))
    return min(MAX_TB, _round_up(pl.cdiv(B, 2), 128))


@jax.jit
def mlp_forward(x, params):
    w1, b1, w2, b2, w3, b3 = params
    B = x.shape[0]
    TB = _pick_batch_tile(B)
    grid = (pl.cdiv(B, TB),)

    resident = lambda a: pl.BlockSpec(a.shape, lambda i: (0,) * a.ndim)

    return pl.pallas_call(
        mlp_kernel,
        out_shape=jax.ShapeDtypeStruct((B, OUT_FEATURES), x.dtype),
        grid=grid,
        in_specs=[
            pl.BlockSpec((TB, IN_FEATURES), lambda i: (i, 0)),  # x: streamed
            resident(w1), resident(b1),
            resident(w2), resident(b2),
            resident(w3), resident(b3),
        ],
        # Last block dim (2) equals the full array dim, so this is legal; the
        # narrow store is masked but writes only the 8 useful bytes per row.
        out_specs=pl.BlockSpec((TB, OUT_FEATURES), lambda i: (i, 0)),
        compiler_params=pltpu.CompilerParams(
            dimension_semantics=("parallel",)),
    )(x, w1, b1, w2, b2, w3, b3)


def init_params(key):
    # Mirrors nn.Linear default init (uniform +/- 1/sqrt(fan_in)); weights
    # stored transposed: fc1 (13,100), fc2 (100,50), fc3 (50,2).
    k1, k2, k3, k4, k5, k6 = jax.random.split(key, 6)

    def uniform_init(k, shape, fan_in):
        bound = 1.0 / jnp.sqrt(fan_in)
        return jax.random.uniform(k, shape, jnp.float32, -bound, bound)

    w1 = uniform_init(k1, (IN_FEATURES, HIDDEN1), IN_FEATURES)
    b1 = uniform_init(k2, (1, HIDDEN1), IN_FEATURES)
    w2 = uniform_init(k3, (HIDDEN1, HIDDEN2), HIDDEN1)
    b2 = uniform_init(k4, (1, HIDDEN2), HIDDEN1)
    w3 = uniform_init(k5, (HIDDEN2, OUT_FEATURES), HIDDEN2)
    b3 = uniform_init(k6, (1, OUT_FEATURES), HIDDEN2)
    return (w1, b1, w2, b2, w3, b3)


def _reference(x, params):
    w1, b1, w2, b2, w3, b3 = params
    h = jnp.maximum(x @ w1 + b1, 0.0)
    h = jnp.maximum(h @ w2 + b2, 0.0)
    return h @ w3 + b3


if __name__ == "__main__":
    key = jax.random.PRNGKey(0)
    pkey, xkey, xkey2, xkey3 = jax.random.split(key, 4)

    params = init_params(pkey)

    # Small batch (matches the toy PyTorch usage); single grid step.
    x_small = jax.random.normal(xkey, (8, IN_FEATURES), dtype=jnp.float32)
    out_small = jax.block_until_ready(mlp_forward(x_small, params))
    assert out_small.shape == (8, OUT_FEATURES)
    assert jnp.allclose(out_small, _reference(x_small, params), atol=1e-5, rtol=1e-5)

    # Medium, non-tile-divisible batch exercises the >=2-step parallel grid
    # and the padded (masked) last tile.
    x_mid = jax.random.normal(xkey2, (300, IN_FEATURES), dtype=jnp.float32)
    out_mid = jax.block_until_ready(mlp_forward(x_mid, params))
    assert out_mid.shape == (300, OUT_FEATURES)
    assert jnp.allclose(out_mid, _reference(x_mid, params), atol=1e-5, rtol=1e-5)

    # Large batch exercises the 2048-row tile cap with multiple grid steps.
    x_big = jax.random.normal(xkey3, (5000, IN_FEATURES), dtype=jnp.float32)
    out_big = jax.block_until_ready(mlp_forward(x_big, params))
    assert out_big.shape == (5000, OUT_FEATURES)
    assert jnp.allclose(out_big, _reference(x_big, params), atol=1e-5, rtol=1e-5)

    print("KERNEL_OK")
</pallas_src>

<mosaic_0001>
module attributes {stable_mosaic.version = 11 : i64} {
  func.func @mlp_kernel(%arg0: i32, %arg1: memref<8x13xf32, #tpu.memory_space<vmem>>, %arg2: memref<13x100xf32, #tpu.memory_space<vmem>>, %arg3: memref<1x100xf32, #tpu.memory_space<vmem>>, %arg4: memref<100x50xf32, #tpu.memory_space<vmem>>, %arg5: memref<1x50xf32, #tpu.memory_space<vmem>>, %arg6: memref<50x2xf32, #tpu.memory_space<vmem>>, %arg7: memref<1x2xf32, #tpu.memory_space<vmem>>, %arg8: memref<8x2xf32, #tpu.memory_space<vmem>>) attributes {dimension_semantics = [#tpu.dimension_semantics<parallel>], iteration_bounds = array<i64: 1>, scalar_prefetch = 0 : i64, scratch_operands = 0 : i64, tpu.core_type = #tpu.core_type<tc>, window_params = [{transform_indices = @transform_0, window_bounds = array<i64: 8, 13>}, {pipeline_mode = #tpu.pipeline_mode<synchronous>, transform_indices = @transform_1, window_bounds = array<i64: 13, 100>}, {pipeline_mode = #tpu.pipeline_mode<synchronous>, transform_indices = @transform_2, window_bounds = array<i64: 1, 100>}, {pipeline_mode = #tpu.pipeline_mode<synchronous>, transform_indices = @transform_3, window_bounds = array<i64: 100, 50>}, {pipeline_mode = #tpu.pipeline_mode<synchronous>, transform_indices = @transform_4, window_bounds = array<i64: 1, 50>}, {pipeline_mode = #tpu.pipeline_mode<synchronous>, transform_indices = @transform_5, window_bounds = array<i64: 50, 2>}, {pipeline_mode = #tpu.pipeline_mode<synchronous>, transform_indices = @transform_6, window_bounds = array<i64: 1, 2>}, {transform_indices = @transform_7, window_bounds = array<i64: 8, 2>}]} {
    %c0 = arith.constant 0 : index
    %c0_0 = arith.constant 0 : index
    %0 = vector.load %arg1[%c0, %c0_0] : memref<8x13xf32, #tpu.memory_space<vmem>>, vector<8x13xf32>
    %c0_1 = arith.constant 0 : index
    %c0_2 = arith.constant 0 : index
    %1 = vector.load %arg2[%c0_1, %c0_2] : memref<13x100xf32, #tpu.memory_space<vmem>>, vector<13x100xf32>
    %cst = arith.constant dense<0.000000e+00> : vector<8x100xf32>
    %2 = tpu.matmul %0, %1, %cst {dimension_numbers = #tpu.dot_dimension_numbers<[1], [0], [0], [1], [0, 0, 1, 1], [], []>} : vector<8x13xf32>, vector<13x100xf32>, vector<8x100xf32> -> vector<8x100xf32>
    %c0_3 = arith.constant 0 : index
    %c0_4 = arith.constant 0 : index
    %3 = vector.load %arg3[%c0_3, %c0_4] : memref<1x100xf32, #tpu.memory_space<vmem>>, vector<1x100xf32>
    %4 = vector.broadcast %3 : vector<1x100xf32> to vector<8x100xf32>
    %5 = arith.addf %2, %4 : vector<8x100xf32>
    %cst_5 = arith.constant 0.000000e+00 : f32
    %6 = vector.broadcast %cst_5 : f32 to vector<8x100xf32>
    %7 = arith.maximumf %5, %6 : vector<8x100xf32>
    %c0_6 = arith.constant 0 : index
    %c0_7 = arith.constant 0 : index
    %8 = vector.load %arg4[%c0_6, %c0_7] : memref<100x50xf32, #tpu.memory_space<vmem>>, vector<100x50xf32>
    %cst_8 = arith.constant dense<0.000000e+00> : vector<8x50xf32>
    %9 = tpu.matmul %7, %8, %cst_8 {dimension_numbers = #tpu.dot_dimension_numbers<[1], [0], [0], [1], [0, 0, 1, 1], [], []>} : vector<8x100xf32>, vector<100x50xf32>, vector<8x50xf32> -> vector<8x50xf32>
    %c0_9 = arith.constant 0 : index
    %c0_10 = arith.constant 0 : index
    %10 = vector.load %arg5[%c0_9, %c0_10] : memref<1x50xf32, #tpu.memory_space<vmem>>, vector<1x50xf32>
    %11 = vector.broadcast %10 : vector<1x50xf32> to vector<8x50xf32>
    %12 = arith.addf %9, %11 : vector<8x50xf32>
    %cst_11 = arith.constant 0.000000e+00 : f32
    %13 = vector.broadcast %cst_11 : f32 to vector<8x50xf32>
    %14 = arith.maximumf %12, %13 : vector<8x50xf32>
    %c0_12 = arith.constant 0 : index
    %c0_13 = arith.constant 0 : index
    %15 = vector.load %arg6[%c0_12, %c0_13] : memref<50x2xf32, #tpu.memory_space<vmem>>, vector<50x2xf32>
    %cst_14 = arith.constant dense<0.000000e+00> : vector<8x2xf32>
    %16 = tpu.matmul %14, %15, %cst_14 {dimension_numbers = #tpu.dot_dimension_numbers<[1], [0], [0], [1], [0, 0, 1, 1], [], []>} : vector<8x50xf32>, vector<50x2xf32>, vector<8x2xf32> -> vector<8x2xf32>
    %c0_15 = arith.constant 0 : index
    %c0_16 = arith.constant 0 : index
    %17 = vector.load %arg7[%c0_15, %c0_16] : memref<1x2xf32, #tpu.memory_space<vmem>>, vector<1x2xf32>
    %18 = vector.broadcast %17 : vector<1x2xf32> to vector<8x2xf32>
    %19 = arith.addf %16, %18 : vector<8x2xf32>
    %c0_17 = arith.constant 0 : index
    %c0_18 = arith.constant 0 : index
    %20 = vector.load %arg8[%c0_17, %c0_18] : memref<8x2xf32, #tpu.memory_space<vmem>>, vector<8x2xf32>
    tpu.vector_store %arg8[%c0_17, %c0_18], %19 {strides = array<i32>} : memref<8x2xf32, #tpu.memory_space<vmem>>, vector<8x2xf32>,
    return
  }
  func.func @transform_0(%arg0: i32) -> (i32, i32) {
    %c0_i32 = arith.constant 0 : i32
    %c0_i32_0 = arith.constant 0 : i32
    return %arg0, %c0_i32 : i32, i32
  }
  func.func @transform_1(%arg0: i32) -> (i32, i32) {
    %c0_i32 = arith.constant 0 : i32
    %c0_i32_0 = arith.constant 0 : i32
    %c0_i32_1 = arith.constant 0 : i32
    return %c0_i32, %c0_i32_0 : i32, i32
  }
  func.func @transform_2(%arg0: i32) -> (i32, i32) {
    %c0_i32 = arith.constant 0 : i32
    %c0_i32_0 = arith.constant 0 : i32
    %c0_i32_1 = arith.constant 0 : i32
    return %c0_i32, %c0_i32_0 : i32, i32
  }
  func.func @transform_3(%arg0: i32) -> (i32, i32) {
    %c0_i32 = arith.constant 0 : i32
    %c0_i32_0 = arith.constant 0 : i32
    %c0_i32_1 = arith.constant 0 : i32
    return %c0_i32, %c0_i32_0 : i32, i32
  }
  func.func @transform_4(%arg0: i32) -> (i32, i32) {
    %c0_i32 = arith.constant 0 : i32
    %c0_i32_0 = arith.constant 0 : i32
    %c0_i32_1 = arith.constant 0 : i32
    return %c0_i32, %c0_i32_0 : i32, i32
  }
  func.func @transform_5(%arg0: i32) -> (i32, i32) {
    %c0_i32 = arith.constant 0 : i32
    %c0_i32_0 = arith.constant 0 : i32
    %c0_i32_1 = arith.constant 0 : i32
    return %c0_i32, %c0_i32_0 : i32, i32
  }
  func.func @transform_6(%arg0: i32) -> (i32, i32) {
    %c0_i32 = arith.constant 0 : i32
    %c0_i32_0 = arith.constant 0 : i32
    %c0_i32_1 = arith.constant 0 : i32
    return %c0_i32, %c0_i32_0 : i32, i32
  }
  func.func @transform_7(%arg0: i32) -> (i32, i32) {
    %c0_i32 = arith.constant 0 : i32
    %c0_i32_0 = arith.constant 0 : i32
    return %arg0, %c0_i32 : i32, i32
  }
}

</mosaic_0001>

<bundles_post_ra>
// kernel: mlp_forward.1
= control target key start
LH: loop header
LB: loop body
LE: loop exit
PB: predicated region body
PF: predicated region fallthrough
CT: control target
= control target key end

     0   :  { %vm40_vm0 = vcmask 1044480   ;;  %v401_v0 = vmov 0.0   ;;  %vm402_vm1 = vmmov 0   ;;  %vm139_vm2 = vcmask 1043456   ;;  %s552_s1 = inlined_call_operand.vmem [shape: f32[13,100], index: 1, kind: input, shape index: {}]   ;;  %s553_s0 = inlined_call_operand.vmem [shape: f32[8,13], index: 0, kind: input, shape index: {}]   ;;  %s554_s3 = inlined_call_operand.vmem [shape: f32[100,50], index: 3, kind: input, shape index: {}]   ;;  %s555_s5 = inlined_call_operand.vmem [shape: f32[50,2], index: 5, kind: input, shape index: {}]   ;;  %s556_s2 = inlined_call_operand.vmem [shape: f32[1,100], index: 2, kind: input, shape index: {}]   ;;  %s557_s4 = inlined_call_operand.vmem [shape: f32[1,50], index: 4, kind: input, shape index: {}]   ;;  %s558_s6 = inlined_call_operand.vmem [shape: f32[1,2], index: 6, kind: input, shape index: {}]   ;;  %s559_s7 = inlined_call_operand.vmem [shape: f32[8,2], index: 7, kind: output, shape index: {}]  }
   0x1   :  { %346 = vmatprep.subr.mxu0 %v401_v0  ;;  %v28_v1 = vld [vmem:[%s552_s1 + $0x8] sm:$0x1f]  ;;  %v27_v2 = vld [vmem:[%s552_s1] sm:$0xff]  ;;  %350 = vmatprep.mubr.msk.f32.mxu0 %vm402_vm1, %v401_v0  ;;  %vm36_vm3 = vcmask 105472   ;;  %v126_v5 = vld [vmem:[%s554_s3 + $0x58] sm:$0xff]  ;;  %vm232_vm4 = vcmask 1041408  }
   0x2   :  { %347 = vmatpush3.msk.msra.mxu0 %vm40_vm0, %v28_v1  ;;  %v26_v3 = vld [vmem:[%s553_s0] sm:$0xff]  ;;  %353 = vmatprep.subr.mxu1 %v401_v0  ;;  %v125_v6 = vld [vmem:[%s554_s3 + $0x50] sm:$0xff]  ;;  %v124_v7 = vld [vmem:[%s554_s3 + $0x48] sm:$0xff]  ;;  %vm135_vm5 = vcmask 818176   ;;  %vm228_vm6 = vcmask 408576   ;;  %vm306_vm7 = vcmask 15360  }
   0x3   :  { %v127_v4 = vld [vmem:[%s554_s3 + $0x60] sm:$0xf]  ;;  %348 = vmatprep.subr.mxu0 %v401_v0  ;;  %379 = vmatprep.mubr.msk.f32.mxu1 %vm402_vm1, %v401_v0  ;;  %v122_v9 = vld [vmem:[%s554_s3 + $0x38] sm:$0xff]  ;;  %v121_v10 = vld [vmem:[%s554_s3 + $0x30] sm:$0xff] }
   0x4   :  { %354 = vmatpush3.msk.msra.mxu1 %vm139_vm2, %v127_v4  ;;  %349 = vmatpush3.msra.mxu0 %v27_v2  ;;  %v123_v8 = vld [vmem:[%s554_s3 + $0x40] sm:$0xff]  ;;  %v120_v11 = vld [vmem:[%s554_s3 + $0x28] sm:$0xff]  ;;  %v118_v13 = vld [vmem:[%s554_s3 + $0x18] sm:$0xff] }
   0x5   :  { %355 = vmatprep.subr.mxu1 %v401_v0  ;;  %351 = vmatmul.mubr.msk.f32.vlgmr.msra.gmra.mxu0 %vm36_vm3, %v26_v3  ;;  %v119_v12 = vld [vmem:[%s554_s3 + $0x20] sm:$0xff]  ;;  %v117_v14 = vld [vmem:[%s554_s3 + $0x10] sm:$0xff]  ;;  %v116_v15 = vld [vmem:[%s554_s3 + $0x8] sm:$0xff] }
   0x6   :  { %356 = vmatpush3.msra.mxu1 %v126_v5  ;;  %382 = vmatprep.subr.mxu0 %v401_v0  ;;  %v115_v16 = vld [vmem:[%s554_s3] sm:$0xff]  ;;  %v220_v17 = vld [vmem:[%s555_s5 + $0x30] sm:$0x3]  ;;  %v219_v18 = vld [vmem:[%s555_s5 + $0x28] sm:$0xff] }
   0x7   :  { %357 = vmatprep.subr.mxu1 %v401_v0  ;;  %396 = vmatprep.mubr.msk.f32.mxu0 %vm402_vm1, %v401_v0  ;;  %v218_v19 = vld [vmem:[%s555_s5 + $0x20] sm:$0xff]  ;;  %v217_v20 = vld [vmem:[%s555_s5 + $0x18] sm:$0xff]  ;;  %v216_v26 = vld [vmem:[%s555_s5 + $0x10] sm:$0xff] }
   0x8   :  { %358 = vmatpush3.msra.mxu1 %v125_v6  ;;  %383 = vmatpush3.msk.msra.mxu0 %vm232_vm4, %v220_v17  ;;  %v312_v21 = vld [vmem:[%s556_s2] ss:$0 sm:$0xff]  ;;  %v215_v27 = vld [vmem:[%s555_s5 + $0x8] sm:$0xff] }
   0x9   :  { %359 = vmatprep.subr.mxu1 %v401_v0  ;;  %384 = vmatprep.subr.mxu0 %v401_v0  ;;  %v214_v28 = vld [vmem:[%s555_s5] sm:$0xff] }
   0xa   :  { %360 = vmatpush3.msra.mxu1 %v124_v7  ;;  %385 = vmatpush3.msra.mxu0 %v219_v18  ;;  %v315_v29 = vld [vmem:[%s557_s4] ss:$0 sm:$0xff] }
   0xb   :  { %361 = vmatprep.subr.mxu1 %v401_v0  ;;  %386 = vmatprep.subr.mxu0 %v401_v0  ;;  %v318_v34 = vld [vmem:[%s558_s6] ss:$0 sm:$0xff] }
   0xc   :  { %362 = vmatpush3.msra.mxu1 %v123_v8  ;;  %387 = vmatpush3.msra.mxu0 %v218_v19 }
   0xd   :  { %363 = vmatprep.subr.mxu1 %v401_v0  ;;  %388 = vmatprep.subr.mxu0 %v401_v0 }
   0xe   :  { %364 = vmatpush3.msra.mxu1 %v122_v9  ;;  %389 = vmatpush3.msra.mxu0 %v217_v20 }
   0xf   :  { %365 = vmatprep.subr.mxu1 %v401_v0  ;;  %390 = vmatprep.subr.mxu0 %v401_v0 }
  0x10   :  { %366 = vmatpush3.msra.mxu1 %v121_v10  ;;  %391 = vmatpush3.msra.mxu0 %v216_v26 }
  0x11   :  { %367 = vmatprep.subr.mxu1 %v401_v0  ;;  %392 = vmatprep.subr.mxu0 %v401_v0 }
  0x12   :  { %368 = vmatpush3.msra.mxu1 %v120_v11  ;;  %393 = vmatpush3.msra.mxu0 %v215_v27 }
  0x13   :  { %369 = vmatprep.subr.mxu1 %v401_v0  ;;  %394 = vmatprep.subr.mxu0 %v401_v0 }
  0x14   :  { %370 = vmatpush3.msra.mxu1 %v119_v12  ;;  %395 = vmatpush3.msra.mxu0 %v214_v28 }
  0x15   :  { %371 = vmatprep.subr.mxu1 %v401_v0 }
  0x16   :  { %372 = vmatpush3.msra.mxu1 %v118_v13 }
  0x17   :  { %373 = vmatprep.subr.mxu1 %v401_v0 }
  0x18   :  { %374 = vmatpush3.msra.mxu1 %v117_v14 }
  0x19   :  { %375 = vmatprep.subr.mxu1 %v401_v0 }
  0x1a   :  { %376 = vmatpush3.msra.mxu1 %v116_v15 }
  0x1b   :  { %377 = vmatprep.subr.mxu1 %v401_v0 }
  0x1c   :  { %378 = vmatpush3.msra.mxu1 %v115_v16 }
  0xc5   :  { %v110_v22 = vpop.f32.mrf.mxu0 }
  0xc6   :  { %v111_v23 = vadd.f32 %v312_v21, %v110_v22 }
  0xc7   :  { %v352_v24 = vpop.f32.mrf.mxu0 }
  0xc8   :  { %v114_v25 = vmax.f32 %v111_v23, 0.0 }
  0xca   :  { %380 = vmatmul.mubr.msk.f32.vlgmr.msra.gmra.mxu1 %vm135_vm5, %v114_v25 }
 0x18a   :  { %v209_v30 = vpop.f32.mrf.mxu1 }
 0x18b   :  { %v210_v31 = vadd.f32 %v315_v29, %v209_v30 }
 0x18c   :  { %v381_v32 = vpop.f32.mrf.mxu1 }
 0x18d   :  { %v213_v33 = vmax.f32 %v210_v31, 0.0 }
 0x18f   :  { %397 = vmatmul.mubr.msk.f32.vlgmr.msra.gmra.mxu0 %vm228_vm6, %v213_v33 }
 0x24f   :  { %v302_v35 = vpop.f32.mrf.mxu0 }
 0x250   :  { %v303_v36 = vadd.f32 %v318_v34, %v302_v35 }
 0x251   :  { %v398_v37 = vpop.f32.mrf.mxu0 }
 0x252   :  { %307 = vst.msk [vmem:[%s559_s7] sm:$0xff] %vm306_vm7, %v303_v36 }

</bundles_post_ra>
